<compile_context>
chip_gen: v7x
topology: tpu7x:2x2x1
jax: 0.10.0
libtpu: 0.0.40
codegen_flags: <defaults>
</compile_context>

<pallas_src>
import numpy as np
import jax
import jax.numpy as jnp
from jax.experimental import pallas as pl
from jax.experimental.pallas import tpu as pltpu


def _round_up(x, m):
    return (x + m - 1) // m * m


def _build_decomp_block(L, kernel_sizes, r0, r1, c0, c1):
    """Block M[r0:r1, c0:c1] of the fused decomposition matrix.

    M[t, s] = (1/len(ks)) * sum_k (1/k) * #{ j in [0,k) : clip(t+j-front_k, 0, L-1) == s }
    i.e. replicate-padded AvgPool1d(k, stride=1), averaged over kernel sizes
    (front_k = k-1-(k-1)//2, end_k = (k-1)//2, matching the PyTorch module).
    Rows/cols >= L (padding) stay zero.
    """
    blk = np.zeros((r1 - r0, c1 - c0), dtype=np.float32)
    t = np.arange(r0, min(r1, L))
    if t.size == 0:
        return blk
    inv_n = 1.0 / float(len(kernel_sizes))
    for k in kernel_sizes:
        end = (k - 1) // 2
        front = k - 1 - end
        w = inv_n / float(k)
        for j in range(k):
            s = np.clip(t + j - front, 0, L - 1)
            m = (s >= c0) & (s < c1)
            np.add.at(blk, (t[m] - r0, s[m] - c0), w)
    return blk


def _vmem_capacity_bytes():
    try:
        info = pltpu.get_tpu_info()
        cap = getattr(info, "vmem_capacity_bytes", None)
        if cap:
            return int(cap)
    except Exception:
        pass
    return 64 * 1024 * 1024  # conservative: v7x per-TensorCore VMEM


def _pick_lane_tile(n_lanes, cap_tn, per_lane_bytes, fixed_bytes, budget_bytes):
    """Largest 128-multiple lane tile within the VMEM budget, with <=5% padded
    lane waste, preferring >=2 grid tiles (keeps both v7x TensorCores fed)."""
    n128 = _round_up(max(n_lanes, 1), 128)
    cap_tn = max(int(cap_tn), 128)
    best = 128
    for tn in range(128, min(cap_tn, n128) + 1, 128):
        if fixed_bytes + tn * per_lane_bytes > budget_bytes:
            break
        padded = _round_up(n128, tn)
        if (padded - n128) * 20 > n128:          # >5% wasted lane traffic
            continue
        if n128 >= 256 and padded // tn < 2:     # want >=2 parallel tiles
            continue
        best = tn
    return best, _round_up(n128, best)


# ----------------------------- kernels --------------------------------------


def _dense_kernel(m_ref, x_ref, seasonal_ref, trend_ref):
    """Blocks: m (L_pad, L_pad) resident; x/seasonal/trend (L_pad, TN)."""
    trend = jnp.dot(m_ref[...], x_ref[...], preferred_element_type=jnp.float32)
    trend_ref[...] = trend.astype(trend_ref.dtype)
    seasonal_ref[...] = (x_ref[...].astype(jnp.float32) - trend).astype(
        seasonal_ref.dtype)


def _band_kernel(m_ref, x_ref, seasonal_ref, trend_ref, acc_ref):
    """Block-tridiagonal contraction.  Band order is (-1, +1, 0): the diagonal
    comes last so that on the final band step x_ref holds exactly the x block
    the seasonal output needs."""
    i = pl.program_id(1)
    d = pl.program_id(2)

    @pl.when(d == 0)
    def _init():
        acc_ref[...] = jnp.zeros_like(acc_ref)

    # Off-band edge blocks (above row block 0 / below the last one) are all
    # zero by construction; skip their matmul.
    is_zero_block = jnp.logical_or(
        jnp.logical_and(i == 0, d == 0),
        jnp.logical_and(i == pl.num_programs(1) - 1, d == 1))

    @pl.when(jnp.logical_not(is_zero_block))
    def _accumulate():
        acc_ref[...] += jnp.dot(m_ref[0, 0], x_ref[...],
                                preferred_element_type=jnp.float32)

    @pl.when(d == pl.num_programs(2) - 1)
    def _finalize():
        trend = acc_ref[...]
        trend_ref[...] = trend.astype(trend_ref.dtype)
        seasonal_ref[...] = (x_ref[...].astype(jnp.float32) - trend).astype(
            seasonal_ref.dtype)


# ----------------------------- wrapper ---------------------------------------


def multi_scale_hybrid_decomposition(x, kernel_sizes, *, lane_tile=2048,
                                     row_tile=256, dense_max_len=1536,
                                     force_band=False):
    """x: (B, L, C) float array. Returns (seasonal, trend), each (B, L, C)."""
    kernel_sizes = tuple(int(k) for k in kernel_sizes)
    B, L, C = x.shape
    N = B * C
    x_dtype = x.dtype
    m_dtype = jnp.bfloat16 if x_dtype == jnp.bfloat16 else jnp.float32
    x_item = jnp.dtype(x_dtype).itemsize
    m_item = jnp.dtype(m_dtype).itemsize

    vmem_cap = _vmem_capacity_bytes()
    budget = int(vmem_cap * 0.7)          # working-set budget for tiling
    vmem_limit = int(vmem_cap * 0.85)     # explicit scoped-VMEM raise

    # Lane-dense layout: time on sublanes, batch*vars on lanes.
    # TODO(synk): the (B,L,C)<->(L,B*C) transposes are extra HBM passes; a
    # time-major caller could feed/consume (L, B, C) directly and skip them.
    x2 = jnp.transpose(x, (1, 0, 2)).reshape(L, N)

    half_band = max(kernel_sizes) - 1
    use_band = force_band or (L > dense_max_len)

    if not use_band:
        # ----- dense path: one resident (L_pad, L_pad) matrix, grid over lanes
        L_pad = _round_up(L, 8)
        per_lane = 3 * 2 * L_pad * x_item                 # x + 2 outs, 2 bufs
        fixed = 2 * L_pad * L_pad * m_item                # conservative M cost
        TN, N_pad = _pick_lane_tile(N, lane_tile, per_lane, fixed, budget)

        Mp = jnp.asarray(
            _build_decomp_block(L, kernel_sizes, 0, L_pad, 0, L_pad),
            dtype=m_dtype)
        if L_pad == L and N_pad == N:
            x2p = x2
        else:
            x2p = jnp.pad(x2, ((0, L_pad - L), (0, N_pad - N)))

        xo_spec = pl.BlockSpec((L_pad, TN), lambda n: (0, n))
        cost = pl.CostEstimate(
            flops=2 * L_pad * L_pad * N_pad,
            transcendentals=0,
            bytes_accessed=3 * L_pad * N_pad * x_item + L_pad * L_pad * m_item)

        def _call(m_mode):
            if m_mode is None:
                m_spec = pl.BlockSpec((L_pad, L_pad), lambda n: (0, 0))
            else:
                m_spec = pl.BlockSpec((L_pad, L_pad), lambda n: (0, 0),
                                      pipeline_mode=m_mode)
            return pl.pallas_call(
                _dense_kernel,
                out_shape=(jax.ShapeDtypeStruct((L_pad, N_pad), x_dtype),
                           jax.ShapeDtypeStruct((L_pad, N_pad), x_dtype)),
                grid=(N_pad // TN,),
                in_specs=[m_spec, xo_spec],
                out_specs=(xo_spec, xo_spec),
                compiler_params=pltpu.CompilerParams(
                    dimension_semantics=("parallel",),
                    vmem_limit_bytes=vmem_limit),
                cost_estimate=cost,
            )(Mp, x2p)

        try:
            # M is resident (constant index_map): single-buffer it to free VMEM.
            seasonal2, trend2 = _call(pl.Buffered(1))
        except Exception:
            seasonal2, trend2 = _call(None)

    else:
        # ----- band path: block-tridiagonal M, grid over (lanes, rows, band)
        TL = _round_up(max(int(row_tile), half_band, 8), 8)
        L_pad = _round_up(L, TL)
        TL = min(TL, L_pad)
        n_row = L_pad // TL

        per_lane = 3 * 2 * TL * x_item + TL * 4           # tiles + f32 acc
        fixed = 2 * TL * TL * m_item                      # band M block, 2 bufs
        TN, N_pad = _pick_lane_tile(N, lane_tile, per_lane, fixed, budget)

        # Block-banded M: (n_row, 3, TL, TL), band offsets (-1, +1, 0).
        offsets = (-1, +1, 0)
        M_band = np.zeros((n_row, 3, TL, TL), dtype=np.float32)
        for bi in range(n_row):
            for di, off in enumerate(offsets):
                bj = bi + off
                if 0 <= bj < n_row:
                    M_band[bi, di] = _build_decomp_block(
                        L, kernel_sizes, bi * TL, (bi + 1) * TL,
                        bj * TL, (bj + 1) * TL)
        Mp = jnp.asarray(M_band, dtype=m_dtype)
        if L_pad == L and N_pad == N:
            x2p = x2
        else:
            x2p = jnp.pad(x2, ((0, L_pad - L), (0, N_pad - N)))

        def _col_block(i, d):
            off = jnp.where(d == 2, 0, 2 * d - 1)         # (-1, +1, 0)
            return jnp.clip(i + off, 0, n_row - 1)

        m_spec = pl.BlockSpec((1, 1, TL, TL), lambda n, i, d: (i, d, 0, 0))
        x_spec = pl.BlockSpec((TL, TN), lambda n, i, d: (_col_block(i, d), n))
        o_spec = pl.BlockSpec((TL, TN), lambda n, i, d: (i, n))
        cost = pl.CostEstimate(
            flops=2 * TL * TL * 3 * n_row * N_pad,
            transcendentals=0,
            bytes_accessed=5 * L_pad * N_pad * x_item
            + n_row * 3 * TL * TL * m_item)

        seasonal2, trend2 = pl.pallas_call(
            _band_kernel,
            out_shape=(jax.ShapeDtypeStruct((L_pad, N_pad), x_dtype),
                       jax.ShapeDtypeStruct((L_pad, N_pad), x_dtype)),
            grid=(N_pad // TN, n_row, 3),
            in_specs=[m_spec, x_spec],
            out_specs=(o_spec, o_spec),
            scratch_shapes=[pltpu.VMEM((TL, TN), jnp.float32)],
            compiler_params=pltpu.CompilerParams(
                dimension_semantics=("parallel", "parallel", "arbitrary"),
                vmem_limit_bytes=vmem_limit),
            cost_estimate=cost,
        )(Mp, x2p)

    def _unpack(y2):
        if L_pad != L or N_pad != N:
            y2 = y2[:L, :N]
        return jnp.transpose(y2.reshape(L, B, C), (1, 0, 2))

    return _unpack(seasonal2), _unpack(trend2)


# ----------------------------- reference & test ------------------------------


def _reference(x, kernel_sizes):
    """Pure-JAX reference mirroring the PyTorch forward."""
    B, L, C = x.shape
    seasonals, trends = [], []
    for k in kernel_sizes:
        end = (k - 1) // 2
        front = k - 1 - end
        parts = []
        if front > 0:
            parts.append(jnp.repeat(x[:, :1, :], front, axis=1))
        parts.append(x)
        if end > 0:
            parts.append(jnp.repeat(x[:, -1:, :], end, axis=1))
        x_pad = jnp.concatenate(parts, axis=1)
        windows = jnp.stack([x_pad[:, j:j + L, :] for j in range(k)], axis=0)
        trend = windows.mean(axis=0)
        trends.append(trend)
        seasonals.append(x - trend)
    return sum(seasonals) / len(seasonals), sum(trends) / len(trends)


if __name__ == "__main__":
    key = jax.random.PRNGKey(0)
    k0, k1, k2 = jax.random.split(key, 3)
    kernel_sizes = [3, 4, 5, 7]   # mixed odd/even kernel sizes

    # 1) Dense path, f32, small shapes.
    B, L, C = 2, 16, 8
    x = jax.random.normal(k0, (B, L, C), dtype=jnp.float32)
    s, t = multi_scale_hybrid_decomposition(x, kernel_sizes)
    s, t = jax.block_until_ready(s), jax.block_until_ready(t)
    s_ref, t_ref = _reference(x, kernel_sizes)
    assert jnp.allclose(s, s_ref, atol=1e-5, rtol=1e-5), "dense seasonal mismatch"
    assert jnp.allclose(t, t_ref, atol=1e-5, rtol=1e-5), "dense trend mismatch"

    # 2) Band path (forced, small row tile to exercise the block-banded grid).
    B2, L2, C2 = 2, 96, 8
    x2 = jax.random.normal(k1, (B2, L2, C2), dtype=jnp.float32)
    s2, t2 = multi_scale_hybrid_decomposition(
        x2, kernel_sizes, force_band=True, row_tile=32)
    s2, t2 = jax.block_until_ready(s2), jax.block_until_ready(t2)
    s2_ref, t2_ref = _reference(x2, kernel_sizes)
    assert jnp.allclose(s2, s2_ref, atol=1e-5, rtol=1e-5), "band seasonal mismatch"
    assert jnp.allclose(t2, t2_ref, atol=1e-5, rtol=1e-5), "band trend mismatch"

    # 3) bf16 fast path (HBM/MXU in bf16, f32 accumulate) — loose tolerance.
    x3 = jax.random.normal(k2, (B, L, C), dtype=jnp.float32)
    x3b = x3.astype(jnp.bfloat16)
    s3, t3 = multi_scale_hybrid_decomposition(x3b, kernel_sizes)
    s3, t3 = jax.block_until_ready(s3), jax.block_until_ready(t3)
    s3_ref, t3_ref = _reference(x3b.astype(jnp.float32), kernel_sizes)
    assert jnp.allclose(s3.astype(jnp.float32), s3_ref, atol=2e-2), "bf16 seasonal mismatch"
    assert jnp.allclose(t3.astype(jnp.float32), t3_ref, atol=2e-2), "bf16 trend mismatch"

    print("KERNEL_OK")
</pallas_src>

<mosaic_0001>
module attributes {stable_mosaic.version = 11 : i64} {
  func.func @_dense_kernel(%arg0: i32, %arg1: memref<16x16xf32, #tpu.memory_space<vmem>>, %arg2: memref<16x128xf32, #tpu.memory_space<vmem>>, %arg3: memref<16x128xf32, #tpu.memory_space<vmem>>, %arg4: memref<16x128xf32, #tpu.memory_space<vmem>>) attributes {dimension_semantics = [#tpu.dimension_semantics<parallel>], iteration_bounds = array<i64: 1>, scalar_prefetch = 0 : i64, scratch_operands = 0 : i64, tpu.core_type = #tpu.core_type<tc>, window_params = [{pipeline_mode = #tpu.pipeline_mode<synchronous>, transform_indices = @transform_0, window_bounds = array<i64: 16, 16>}, {transform_indices = @transform_1, window_bounds = array<i64: 16, 128>}, {transform_indices = @transform_2, window_bounds = array<i64: 16, 128>}, {transform_indices = @transform_3, window_bounds = array<i64: 16, 128>}]} {
    %c0 = arith.constant 0 : index
    %c0_0 = arith.constant 0 : index
    %0 = vector.load %arg1[%c0, %c0_0] : memref<16x16xf32, #tpu.memory_space<vmem>>, vector<16x16xf32>
    %c0_1 = arith.constant 0 : index
    %c0_2 = arith.constant 0 : index
    %1 = vector.load %arg2[%c0_1, %c0_2] : memref<16x128xf32, #tpu.memory_space<vmem>>, vector<16x128xf32>
    %cst = arith.constant dense<0.000000e+00> : vector<16x128xf32>
    %2 = tpu.matmul %0, %1, %cst {dimension_numbers = #tpu.dot_dimension_numbers<[1], [0], [0], [1], [0, 0, 1, 1], [], []>} : vector<16x16xf32>, vector<16x128xf32>, vector<16x128xf32> -> vector<16x128xf32>
    %c0_3 = arith.constant 0 : index
    %c0_4 = arith.constant 0 : index
    %3 = vector.load %arg4[%c0_3, %c0_4] : memref<16x128xf32, #tpu.memory_space<vmem>>, vector<16x128xf32>
    tpu.vector_store %arg4[%c0_3, %c0_4], %2 {strides = array<i32>} : memref<16x128xf32, #tpu.memory_space<vmem>>, vector<16x128xf32>,
    %c0_5 = arith.constant 0 : index
    %c0_6 = arith.constant 0 : index
    %4 = vector.load %arg2[%c0_5, %c0_6] : memref<16x128xf32, #tpu.memory_space<vmem>>, vector<16x128xf32>
    %5 = arith.subf %4, %2 : vector<16x128xf32>
    %c0_7 = arith.constant 0 : index
    %c0_8 = arith.constant 0 : index
    %6 = vector.load %arg3[%c0_7, %c0_8] : memref<16x128xf32, #tpu.memory_space<vmem>>, vector<16x128xf32>
    tpu.vector_store %arg3[%c0_7, %c0_8], %5 {strides = array<i32>} : memref<16x128xf32, #tpu.memory_space<vmem>>, vector<16x128xf32>,
    return
  }
  func.func @transform_0(%arg0: i32) -> (i32, i32) {
    %c0_i32 = arith.constant 0 : i32
    %c0_i32_0 = arith.constant 0 : i32
    %c0_i32_1 = arith.constant 0 : i32
    return %c0_i32, %c0_i32_0 : i32, i32
  }
  func.func @transform_1(%arg0: i32) -> (i32, i32) {
    %c0_i32 = arith.constant 0 : i32
    %c0_i32_0 = arith.constant 0 : i32
    return %c0_i32, %arg0 : i32, i32
  }
  func.func @transform_2(%arg0: i32) -> (i32, i32) {
    %c0_i32 = arith.constant 0 : i32
    %c0_i32_0 = arith.constant 0 : i32
    return %c0_i32, %arg0 : i32, i32
  }
  func.func @transform_3(%arg0: i32) -> (i32, i32) {
    %c0_i32 = arith.constant 0 : i32
    %c0_i32_0 = arith.constant 0 : i32
    return %c0_i32, %arg0 : i32, i32
  }
}

module attributes {stable_mosaic.version = 11 : i64} {
  func.func @_dense_kernel(%arg0: i32, %arg1: memref<16x16xf32, #tpu.memory_space<vmem>>, %arg2: memref<16x128xf32, #tpu.memory_space<vmem>>, %arg3: memref<16x128xf32, #tpu.memory_space<vmem>>, %arg4: memref<16x128xf32, #tpu.memory_space<vmem>>) attributes {dimension_semantics = [#tpu.dimension_semantics<parallel>], iteration_bounds = array<i64: 1>, scalar_prefetch = 0 : i64, scratch_operands = 0 : i64, tpu.core_type = #tpu.core_type<tc>, window_params = [{pipeline_mode = #tpu.pipeline_mode<synchronous>, transform_indices = @transform_0, window_bounds = array<i64: 16, 16>}, {transform_indices = @transform_1, window_bounds = array<i64: 16, 128>}, {transform_indices = @transform_2, window_bounds = array<i64: 16, 128>}, {transform_indices = @transform_3, window_bounds = array<i64: 16, 128>}]} {
    %c0 = arith.constant 0 : index
    %c0_0 = arith.constant 0 : index
    %0 = vector.load %arg1[%c0, %c0_0] : memref<16x16xf32, #tpu.memory_space<vmem>>, vector<16x16xf32>
    %c0_1 = arith.constant 0 : index
    %c0_2 = arith.constant 0 : index
    %1 = vector.load %arg2[%c0_1, %c0_2] : memref<16x128xf32, #tpu.memory_space<vmem>>, vector<16x128xf32>
    %cst = arith.constant dense<0.000000e+00> : vector<16x128xf32>
    %2 = tpu.matmul %0, %1, %cst {dimension_numbers = #tpu.dot_dimension_numbers<[1], [0], [0], [1], [0, 0, 1, 1], [], []>} : vector<16x16xf32>, vector<16x128xf32>, vector<16x128xf32> -> vector<16x128xf32>
    %c0_3 = arith.constant 0 : index
    %c0_4 = arith.constant 0 : index
    %3 = vector.load %arg4[%c0_3, %c0_4] : memref<16x128xf32, #tpu.memory_space<vmem>>, vector<16x128xf32>
    tpu.vector_store %arg4[%c0_3, %c0_4], %2 {strides = array<i32>} : memref<16x128xf32, #tpu.memory_space<vmem>>, vector<16x128xf32>,
    %c0_5 = arith.constant 0 : index
    %c0_6 = arith.constant 0 : index
    %4 = vector.load %arg2[%c0_5, %c0_6] : memref<16x128xf32, #tpu.memory_space<vmem>>, vector<16x128xf32>
    %5 = arith.subf %4, %2 : vector<16x128xf32>
    %c0_7 = arith.constant 0 : index
    %c0_8 = arith.constant 0 : index
    %6 = vector.load %arg3[%c0_7, %c0_8] : memref<16x128xf32, #tpu.memory_space<vmem>>, vector<16x128xf32>
    tpu.vector_store %arg3[%c0_7, %c0_8], %5 {strides = array<i32>} : memref<16x128xf32, #tpu.memory_space<vmem>>, vector<16x128xf32>,
    return
  }
  func.func @transform_0(%arg0: i32) -> (i32, i32) {
    %c0_i32 = arith.constant 0 : i32
    %c0_i32_0 = arith.constant 0 : i32
    %c0_i32_1 = arith.constant 0 : i32
    return %c0_i32, %c0_i32_0 : i32, i32
  }
  func.func @transform_1(%arg0: i32) -> (i32, i32) {
    %c0_i32 = arith.constant 0 : i32
    %c0_i32_0 = arith.constant 0 : i32
    return %c0_i32, %arg0 : i32, i32
  }
  func.func @transform_2(%arg0: i32) -> (i32, i32) {
    %c0_i32 = arith.constant 0 : i32
    %c0_i32_0 = arith.constant 0 : i32
    return %c0_i32, %arg0 : i32, i32
  }
  func.func @transform_3(%arg0: i32) -> (i32, i32) {
    %c0_i32 = arith.constant 0 : i32
    %c0_i32_0 = arith.constant 0 : i32
    return %c0_i32, %arg0 : i32, i32
  }
}

</mosaic_0001>

<bundles_post_ra>
// kernel: tpu_custom_call.1
= control target key start
LH: loop header
LB: loop body
LE: loop exit
PB: predicated region body
PF: predicated region fallthrough
CT: control target
= control target key end

     0   :  { %9 = vsyncpa [#allocation3], 0  ;;  %s383_s0 = inlined_call_operand.hbm [shape: f32[16,16], index: 0, kind: input, shape index: {}]   ;;  %s384_s1 = inlined_call_operand.hbm [shape: f32[16,128], index: 1, kind: input, shape index: {}]   ;;  %s385_s2 = inlined_call_operand.hbm [shape: f32[16,128], index: 2, kind: output, shape index: {0}]   ;;  %s386_s3 = inlined_call_operand.hbm [shape: f32[16,128], index: 3, kind: output, shape index: {1}]  }
   0x1   :  { %10 = vsyncpa [#allocation6], 0 }
   0x2   :  { %11 = vsyncpa [#allocation4], 0 }
   0x3   :  { %12 = vsyncpa [#allocation9], 0  ;;  %s290_s12 = smov [#allocation2]   ;;  %s194_s16 = scalar_lea.hbm %s383_s0, 256 }
   0x4   :  { %s18_s13 = sshll.u32 %s290_s12, 4  ;;  %p195_p0 = scmp.ne.s32.totalorder %s383_s0, %s194_s16  ;;  %s19_s13 = int_to_ptr.vmem [resolvable:$true] %s18_s13 }
   0x5   :  { %p198_p1 = scmp.lt.u32.totalorder %s194_s16, %s383_s0 }
   0x7   :  { %p200_p2 = pnand %p198_p1, %p195_p0 }
   0x9   :  { %203 = shalt.err (!%p200_p2)
}
   0xa   :  { %s204_s21 = scalar_lea.vmem %s19_s13, 256  ;;  %p209_p4 = scmp.lt.s32.totalorder %s19_s13, %s19_s13 }
   0xb   :  { %p205_p3 = scmp.ne.s32.totalorder %s19_s13, %s204_s21  ;;  %p210_p5 = scmp.lt.s32.totalorder %s204_s21, %s204_s21 }
   0xd   :  { %p211_p6 = por %p210_p5, %p209_p4 }
   0xf   :  { %p212_p7 = pnand %p211_p6, %p205_p3 }
  0x11   :  { %215 = shalt.err (!%p212_p7)
}
  0x12   :  { %s291_s22 = smov 128   ;;  %s292_s23 = smov 8  }
  0x13   :  { %24 = dma.hbm_to_vmem [thread:$0]  %s383_s0, 256, %s19_s13, [#allocation3], %s291_s22, %s291_s22, %s292_s23  }
  0x14   :  { %s293_s26 = smov [#allocation5]   ;;  %s216_s30 = scalar_lea.hbm %s384_s1, 256 }
  0x15   :  { %s30_s27 = sshll.u32 %s293_s26, 4  ;;  %p217_p8 = scmp.ne.s32.totalorder %s384_s1, %s216_s30  ;;  %s31_s27 = int_to_ptr.vmem [resolvable:$true] %s30_s27 }
  0x16   :  { %p220_p9 = scmp.lt.u32.totalorder %s216_s30, %s384_s1 }
  0x18   :  { %p222_p10 = pnand %p220_p9, %p217_p8 }
  0x1a   :  { %225 = shalt.err (!%p222_p10)
}
  0x1b   :  { %s226_s8 = scalar_lea.vmem %s31_s27, 256  ;;  %p231_p12 = scmp.lt.s32.totalorder %s31_s27, %s31_s27 }
  0x1c   :  { %p227_p11 = scmp.ne.s32.totalorder %s31_s27, %s226_s8  ;;  %p232_p13 = scmp.lt.s32.totalorder %s226_s8, %s226_s8 }
  0x1e   :  { %p233_p0 = por %p232_p13, %p231_p12 }
  0x20   :  { %p234_p1 = pnand %p233_p0, %p227_p11 }
  0x22   :  { %237 = shalt.err (!%p234_p1)
}
  0x23   :  { %36 = dma.hbm_to_vmem [thread:$0]  %s384_s1, 256, %s31_s27, [#allocation6], %s291_s22, %s291_s22, %s292_s23  }
  0x24   :  { %282 = dma.done.wait [#allocation3], 256  }
  0x25   :  { %283 = vsyncadd [#allocation3], 4294967040 }
  0x26   :  { %284 = dma.done.wait [#allocation6], 256  }
  0x27   :  { %285 = vsyncadd [#allocation6], 4294967040  ;;  %vm47_vm0 = vcmask 130048   ;;  %v45_v0 = vld [vmem:[#allocation5] sm:$0xff]  ;;  %v46_v1 = vld [vmem:[#allocation5 + $0x8] sm:$0xff]  ;;  %s294_s10 = smov [#allocation8]  }
  0x28   :  { %v43_v2 = vld [vmem:[#allocation2] sm:$0xff]  ;;  %v184_v3 = vpack.c.bf16 %v46_v1, %v45_v0  ;;  %v44_v4 = vld [vmem:[#allocation2 + $0x8] sm:$0xff]  ;;  %s154_s11 = sshll.u32 %s294_s10, 4  ;;  %s295_s12 = smov [#allocation7]   ;;  %s155_s11 = int_to_ptr.vmem [resolvable:$true] %s154_s11 }
  0x29   :  { %181 = vmatprep.mubr.msk.f32.mxu0 %vm47_vm0, %v43_v2  ;;  %s142_s13 = sshll.u32 %s295_s12, 4  ;;  %s238_s1 = scalar_lea.vmem %s155_s11, 256  ;;  %s346_s13 = int_to_ptr.vmem [resolvable:$true] %s142_s13 }
  0x2a   :  { %185 = vmatprep.subr.bf16.mxu0 %v184_v3  ;;  %p239_p2 = scmp.ne.s32.totalorder %s155_s11, %s238_s1  ;;  %p243_p3 = scmp.lt.s32.totalorder %s155_s11, %s155_s11 }
  0x2b   :  { %187 = vmatpush3.bf16.msra.mxu0 %v184_v3  ;;  %p244_p4 = scmp.lt.s32.totalorder %s238_s1, %s238_s1 }
  0x2d   :  { %p245_p5 = por %p244_p4, %p243_p3 }
  0x2e   :  { %182 = vmatmul.mubr.msk.f32.vlgmr.msra.gmra.mrb[0].mxu0 %vm47_vm0, %v44_v4 }
  0x2f   :  { %p246_p6 = pnand %p245_p5, %p239_p2 }
 0x101   :  { %v183_v5 = vpop.f32.mrb[0].mxu0 }
 0x102   :  { %130 = vst [vmem:[#allocation8 + $0x8] sm:$0xff] %v183_v5  ;;  %v134_v6 = vsub.f32 %v46_v1, %v183_v5  ;;  %v120_v7 = vpop.f32.mrb[1].mxu0 }
 0x103   :  { %129 = vst [vmem:[#allocation8] sm:$0xff] %v120_v7  ;;  %v133_v8 = vsub.f32 %v45_v0, %v120_v7 }
 0x104   :  { %136 = vst [vmem:[#allocation7 + $0x8] sm:$0xff] %v134_v6 }
 0x105   :  { %249 = shalt.err (!%p246_p6)
}
 0x106   :  { %s250_s16 = scalar_lea.hbm %s386_s3, 256 }
 0x107   :  { %p251_p7 = scmp.ne.s32.totalorder %s386_s3, %s250_s16  ;;  %p254_p8 = scmp.lt.u32.totalorder %s250_s16, %s386_s3 }
 0x109   :  { %p256_p9 = pnand %p254_p8, %p251_p7 }
 0x10b   :  { %259 = shalt.err (!%p256_p9)
}
 0x10c   :  { %160 = dma.vmem_to_hbm [thread:$0]  %s155_s11, 256, %s386_s3, [#allocation9], %s291_s22, %s291_s22, %s292_s23   ;;  %135 = vst [vmem:[#allocation7] sm:$0xff] %v133_v8 }
 0x10d   :  { %s260_s25 = scalar_lea.vmem %s346_s13, 256  ;;  %p265_p11 = scmp.lt.s32.totalorder %s346_s13, %s346_s13 }
 0x10e   :  { %p261_p10 = scmp.ne.s32.totalorder %s346_s13, %s260_s25  ;;  %p266_p12 = scmp.lt.s32.totalorder %s260_s25, %s260_s25 }
 0x110   :  { %p267_p13 = por %p266_p12, %p265_p11 }
 0x112   :  { %p268_p0 = pnand %p267_p13, %p261_p10 }
 0x114   :  { %271 = shalt.err (!%p268_p0)
}
 0x115   :  { %s272_s28 = scalar_lea.hbm %s385_s2, 256 }
 0x116   :  { %p273_p1 = scmp.ne.s32.totalorder %s385_s2, %s272_s28  ;;  %p276_p2 = scmp.lt.u32.totalorder %s272_s28, %s385_s2 }
 0x118   :  { %p278_p3 = pnand %p276_p2, %p273_p1 }
 0x11a   :  { %281 = shalt.err (!%p278_p3)
}
 0x11b   :  { %148 = dma.vmem_to_hbm [thread:$0]  %s346_s13, 256, %s385_s2, [#allocation4], %s291_s22, %s291_s22, %s292_s23  }
 0x11c   :  { %286 = dma.done.wait [#allocation4], 256  }
 0x11d   :  { %287 = vsyncadd [#allocation4], 4294967040 }
 0x11e   :  { %288 = dma.done.wait [#allocation9], 256  }
 0x11f   :  { %289 = vsyncadd [#allocation9], 4294967040 }
 0x120   :  { %167 = vsyncpa [#allocation3], 1 }
 0x121   :  { %168 = vsyncpa [#allocation6], 1 }
 0x122   :  { %169 = vsyncpa [#allocation4], 1 }
 0x123   :  { %170 = vsyncpa [#allocation9], 1 }

// kernel: tpu_custom_call.1
= control target key start
LH: loop header
LB: loop body
LE: loop exit
PB: predicated region body
PF: predicated region fallthrough
CT: control target
= control target key end

     0   :  { %9 = vsyncpa [#allocation3], 0  ;;  %s383_s0 = inlined_call_operand.hbm [shape: f32[16,16], index: 0, kind: input, shape index: {}]   ;;  %s384_s1 = inlined_call_operand.hbm [shape: f32[16,128], index: 1, kind: input, shape index: {}]   ;;  %s385_s2 = inlined_call_operand.hbm [shape: f32[16,128], index: 2, kind: output, shape index: {0}]   ;;  %s386_s3 = inlined_call_operand.hbm [shape: f32[16,128], index: 3, kind: output, shape index: {1}]  }
   0x1   :  { %10 = vsyncpa [#allocation6], 0 }
   0x2   :  { %11 = vsyncpa [#allocation4], 0 }
   0x3   :  { %12 = vsyncpa [#allocation9], 0  ;;  %s290_s12 = smov [#allocation2]   ;;  %s194_s16 = scalar_lea.hbm %s383_s0, 256 }
   0x4   :  { %s18_s13 = sshll.u32 %s290_s12, 4  ;;  %p195_p0 = scmp.ne.s32.totalorder %s383_s0, %s194_s16  ;;  %s19_s13 = int_to_ptr.vmem [resolvable:$true] %s18_s13 }
   0x5   :  { %p198_p1 = scmp.lt.u32.totalorder %s194_s16, %s383_s0 }
   0x7   :  { %p200_p2 = pnand %p198_p1, %p195_p0 }
   0x9   :  { %203 = shalt.err (!%p200_p2)
}
   0xa   :  { %s204_s21 = scalar_lea.vmem %s19_s13, 256  ;;  %p209_p4 = scmp.lt.s32.totalorder %s19_s13, %s19_s13 }
   0xb   :  { %p205_p3 = scmp.ne.s32.totalorder %s19_s13, %s204_s21  ;;  %p210_p5 = scmp.lt.s32.totalorder %s204_s21, %s204_s21 }
   0xd   :  { %p211_p6 = por %p210_p5, %p209_p4 }
   0xf   :  { %p212_p7 = pnand %p211_p6, %p205_p3 }
  0x11   :  { %215 = shalt.err (!%p212_p7)
}
  0x12   :  { %s291_s22 = smov 128   ;;  %s292_s23 = smov 8  }
  0x13   :  { %24 = dma.hbm_to_vmem [thread:$0]  %s383_s0, 256, %s19_s13, [#allocation3], %s291_s22, %s291_s22, %s292_s23  }
  0x14   :  { %s293_s26 = smov [#allocation5]   ;;  %s216_s30 = scalar_lea.hbm %s384_s1, 256 }
  0x15   :  { %s30_s27 = sshll.u32 %s293_s26, 4  ;;  %p217_p8 = scmp.ne.s32.totalorder %s384_s1, %s216_s30  ;;  %s31_s27 = int_to_ptr.vmem [resolvable:$true] %s30_s27 }
  0x16   :  { %p220_p9 = scmp.lt.u32.totalorder %s216_s30, %s384_s1 }
  0x18   :  { %p222_p10 = pnand %p220_p9, %p217_p8 }
  0x1a   :  { %225 = shalt.err (!%p222_p10)
}
  0x1b   :  { %s226_s8 = scalar_lea.vmem %s31_s27, 256  ;;  %p231_p12 = scmp.lt.s32.totalorder %s31_s27, %s31_s27 }
  0x1c   :  { %p227_p11 = scmp.ne.s32.totalorder %s31_s27, %s226_s8  ;;  %p232_p13 = scmp.lt.s32.totalorder %s226_s8, %s226_s8 }
  0x1e   :  { %p233_p0 = por %p232_p13, %p231_p12 }
  0x20   :  { %p234_p1 = pnand %p233_p0, %p227_p11 }
  0x22   :  { %237 = shalt.err (!%p234_p1)
}
  0x23   :  { %36 = dma.hbm_to_vmem [thread:$0]  %s384_s1, 256, %s31_s27, [#allocation6], %s291_s22, %s291_s22, %s292_s23  }
  0x24   :  { %282 = dma.done.wait [#allocation3], 256  }
  0x25   :  { %283 = vsyncadd [#allocation3], 4294967040 }
  0x26   :  { %284 = dma.done.wait [#allocation6], 256  }
  0x27   :  { %285 = vsyncadd [#allocation6], 4294967040  ;;  %vm47_vm0 = vcmask 130048   ;;  %v45_v0 = vld [vmem:[#allocation5] sm:$0xff]  ;;  %v46_v1 = vld [vmem:[#allocation5 + $0x8] sm:$0xff]  ;;  %s294_s10 = smov [#allocation8]  }
  0x28   :  { %v43_v2 = vld [vmem:[#allocation2] sm:$0xff]  ;;  %v184_v3 = vpack.c.bf16 %v46_v1, %v45_v0  ;;  %v44_v4 = vld [vmem:[#allocation2 + $0x8] sm:$0xff]  ;;  %s154_s11 = sshll.u32 %s294_s10, 4  ;;  %s295_s12 = smov [#allocation7]   ;;  %s155_s11 = int_to_ptr.vmem [resolvable:$true] %s154_s11 }
  0x29   :  { %181 = vmatprep.mubr.msk.f32.mxu0 %vm47_vm0, %v43_v2  ;;  %s142_s13 = sshll.u32 %s295_s12, 4  ;;  %s238_s1 = scalar_lea.vmem %s155_s11, 256  ;;  %s346_s13 = int_to_ptr.vmem [resolvable:$true] %s142_s13 }
  0x2a   :  { %185 = vmatprep.subr.bf16.mxu0 %v184_v3  ;;  %p239_p2 = scmp.ne.s32.totalorder %s155_s11, %s238_s1  ;;  %p243_p3 = scmp.lt.s32.totalorder %s155_s11, %s155_s11 }
  0x2b   :  { %187 = vmatpush3.bf16.msra.mxu0 %v184_v3  ;;  %p244_p4 = scmp.lt.s32.totalorder %s238_s1, %s238_s1 }
  0x2d   :  { %p245_p5 = por %p244_p4, %p243_p3 }
  0x2e   :  { %182 = vmatmul.mubr.msk.f32.vlgmr.msra.gmra.mrb[0].mxu0 %vm47_vm0, %v44_v4 }
  0x2f   :  { %p246_p6 = pnand %p245_p5, %p239_p2 }
 0x101   :  { %v183_v5 = vpop.f32.mrb[0].mxu0 }
 0x102   :  { %130 = vst [vmem:[#allocation8 + $0x8] sm:$0xff] %v183_v5  ;;  %v134_v6 = vsub.f32 %v46_v1, %v183_v5  ;;  %v120_v7 = vpop.f32.mrb[1].mxu0 }
 0x103   :  { %129 = vst [vmem:[#allocation8] sm:$0xff] %v120_v7  ;;  %v133_v8 = vsub.f32 %v45_v0, %v120_v7 }
 0x104   :  { %136 = vst [vmem:[#allocation7 + $0x8] sm:$0xff] %v134_v6 }
 0x105   :  { %249 = shalt.err (!%p246_p6)
}
 0x106   :  { %s250_s16 = scalar_lea.hbm %s386_s3, 256 }
 0x107   :  { %p251_p7 = scmp.ne.s32.totalorder %s386_s3, %s250_s16  ;;  %p254_p8 = scmp.lt.u32.totalorder %s250_s16, %s386_s3 }
 0x109   :  { %p256_p9 = pnand %p254_p8, %p251_p7 }
 0x10b   :  { %259 = shalt.err (!%p256_p9)
}
 0x10c   :  { %160 = dma.vmem_to_hbm [thread:$0]  %s155_s11, 256, %s386_s3, [#allocation9], %s291_s22, %s291_s22, %s292_s23   ;;  %135 = vst [vmem:[#allocation7] sm:$0xff] %v133_v8 }
 0x10d   :  { %s260_s25 = scalar_lea.vmem %s346_s13, 256  ;;  %p265_p11 = scmp.lt.s32.totalorder %s346_s13, %s346_s13 }
 0x10e   :  { %p261_p10 = scmp.ne.s32.totalorder %s346_s13, %s260_s25  ;;  %p266_p12 = scmp.lt.s32.totalorder %s260_s25, %s260_s25 }
 0x110   :  { %p267_p13 = por %p266_p12, %p265_p11 }
 0x112   :  { %p268_p0 = pnand %p267_p13, %p261_p10 }
 0x114   :  { %271 = shalt.err (!%p268_p0)
}
 0x115   :  { %s272_s28 = scalar_lea.hbm %s385_s2, 256 }
 0x116   :  { %p273_p1 = scmp.ne.s32.totalorder %s385_s2, %s272_s28  ;;  %p276_p2 = scmp.lt.u32.totalorder %s272_s28, %s385_s2 }
 0x118   :  { %p278_p3 = pnand %p276_p2, %p273_p1 }
 0x11a   :  { %281 = shalt.err (!%p278_p3)
}
 0x11b   :  { %148 = dma.vmem_to_hbm [thread:$0]  %s346_s13, 256, %s385_s2, [#allocation4], %s291_s22, %s291_s22, %s292_s23  }
 0x11c   :  { %286 = dma.done.wait [#allocation4], 256  }
 0x11d   :  { %287 = vsyncadd [#allocation4], 4294967040 }
 0x11e   :  { %288 = dma.done.wait [#allocation9], 256  }
 0x11f   :  { %289 = vsyncadd [#allocation9], 4294967040 }
 0x120   :  { %167 = vsyncpa [#allocation3], 1 }
 0x121   :  { %168 = vsyncpa [#allocation6], 1 }
 0x122   :  { %169 = vsyncpa [#allocation4], 1 }
 0x123   :  { %170 = vsyncpa [#allocation9], 1 }

</bundles_post_ra>
